<compile_context>
chip_gen: v5e
topology: v5e:2x2
jax: 0.10.0
libtpu: 0.0.40
codegen_flags: <defaults>
</compile_context>

<pallas_src>
import functools

import jax
import jax.numpy as jnp
from jax import lax
from jax.experimental import pallas as pl
from jax.experimental.pallas import tpu as pltpu


_TARGET_BLOCK_BYTES = 4 * 1024 * 1024   # ~4 MiB per input block (near HBM roofline)


def _round_up(a, b):
    return ((a + b - 1) // b) * b


def _sublane_multiple(dtype):
    itemsize = jnp.dtype(dtype).itemsize
    if itemsize >= 4:
        return 8
    if itemsize == 2:
        return 16
    return 32


def _choose_group(ho, wo):
    """Largest useful G with G | Ho so the packed output row (G*Wo lanes) is lane-dense
    (>= 128 lanes) without letting the packed row / selection matrix get too wide."""
    target = -(-128 // wo)              # ceil(128 / Wo)
    best = 1
    for g in range(1, ho + 1):
        if ho % g:
            continue
        if g * wo > 512:                # keep dec matrix & per-row width bounded
            break
        best = g
        if g >= target:
            break
    return best


def _pool_drop_kernel(x_ref, e_ref, s_ref, o_ref, *, grp, wt, precision):
    # x_ref: (TR, G*2*Wt) -- G row-pairs per row: [top_0|bot_0|top_1|bot_1|...], width Wt each
    # e_ref: (K, G*Wo)    -- 0/1 selection matrix (K = Wt if G == 1 else G*2*Wt)
    # s_ref: (TR, 1)      -- per-row Dropout2d scale (0 or 1/(1-p); 1 in eval mode)
    # o_ref: (TR, G*Wo)   -- pooled (and dropout-scaled) output rows
    x = x_ref[...]
    lanes = x.shape[-1]

    if grp == 1:
        # Vertical (H) pair max: the two image rows are contiguous lane halves.
        r = jnp.maximum(x[:, :wt], x[:, wt:])                          # (TR, Wt)
        width = wt
    else:
        # Packed groups: the bottom row sits Wt lanes to the right -> XLU rotate.
        # roll(x, lanes - wt)[p] == x[(p + wt) % lanes]
        r = jnp.maximum(x, pltpu.roll(x, shift=lanes - wt, axis=1))    # (TR, G*2*Wt)
        width = lanes

    # Horizontal (W) pair max BEFORE decimation (halves the selection matmul):
    # roll(r, width - 1)[p] == r[(p + 1) % width]  ->  h[p] = max(r[p], r[p+1]).
    h = jnp.maximum(r, pltpu.roll(r, shift=width - 1, axis=1))

    # Exact 0/1 selection of the even lane positions on the otherwise-idle MXU.
    pooled = jnp.dot(h, e_ref[...], preferred_element_type=jnp.float32,
                     precision=precision)                              # (TR, G*Wo) f32

    # Dropout2d: whole-channel scale, fused here (no extra HBM pass).
    o_ref[...] = (pooled * s_ref[...]).astype(o_ref.dtype)


def make_dropout2d_scale(key, n, c, p, *, training=True, dtype=jnp.float32):
    """Per-(n, c) channel scale matching nn.Dropout2d semantics (0 or 1/(1-p))."""
    if (not training) or p == 0.0:
        return jnp.ones((n, c), dtype)
    keep = jax.random.bernoulli(key, 1.0 - p, (n, c))
    return keep.astype(dtype) / jnp.asarray(1.0 - p, dtype)


def pool_drop_forward(x, channel_scale):
    """MaxPool2d(2) followed by Dropout2d (given as a per-channel scale).

    x:             (N, C, H, W)  NCHW, as in PyTorch
    channel_scale: (N, C)        0 or 1/(1-p) per channel (ones for eval mode)
    returns:       (N, C, H//2, W//2)
    """
    N, C, H, W = x.shape
    Ho, Wo = H // 2, W // 2
    if (H % 2) or (W % 2):
        # TODO(synk): for odd H/W this slice makes the reshape below non-contiguous, so
        # XLA materializes one extra copy of the input (MaxPool2d floor mode); even
        # spatial dims (the common UNet case) take the copy-free path.
        x = x[:, :, : 2 * Ho, : 2 * Wo]

    Wt = 2 * Wo
    M = N * C * Ho
    dtype = x.dtype
    itemsize = jnp.dtype(dtype).itemsize
    sub = _sublane_multiple(dtype)

    # Lane-dense packing: G row-pairs of the same channel per kernel row (G | Ho).
    G = _choose_group(Ho, Wo)
    Mp = M // G
    lanes_in = G * 2 * Wt
    lanes_out = G * Wo

    # Contiguous (free) view of the NCHW input.
    xv = x.reshape(Mp, lanes_in)

    # Per-kernel-row dropout scale (constant within a channel; G | Ho keeps every packed
    # row inside one channel, so a single scalar per row suffices).
    rows_per_chan = Ho // G
    scale_rows = jnp.repeat(channel_scale.reshape(N * C).astype(jnp.float32), rows_per_chan)
    scale_rows = scale_rows.reshape(Mp, 1)

    # 0/1 selection matrix:  output column (g*Wo + j)  <-  h lane (g*2*Wt + 2j)
    # (or lane 2j when G == 1, where h only has Wt lanes).
    K = Wt if G == 1 else lanes_in
    ri = lax.broadcasted_iota(jnp.int32, (K, lanes_out), 0)
    cj = lax.broadcasted_iota(jnp.int32, (K, lanes_out), 1)
    if G == 1:
        src = 2 * cj
    else:
        src = (cj // Wo) * (2 * Wt) + 2 * (cj % Wo)
    dec = (ri == src).astype(dtype)

    # Byte-targeted row tile; capped so the grid has ~8+ steps when the problem allows
    # (keeps both v7x TensorCores busy and the DMA pipeline deep).
    row_bytes = lanes_in * itemsize
    tr = max(sub, (_TARGET_BLOCK_BYTES // row_bytes) // sub * sub)
    tr = min(tr, max(sub, _round_up(pl.cdiv(Mp, 8), sub)))
    tr = min(tr, _round_up(Mp, sub))

    # VMEM budget derived from the actual (double-buffered) block sizes.
    in_blk = tr * lanes_in * itemsize
    out_blk = tr * lanes_out * itemsize
    dec_blk = K * lanes_out * itemsize
    scl_blk = tr * 128 * 4                       # (tr, 1) pads to 128 lanes in VMEM
    need = 2 * (in_blk + out_blk + dec_blk + scl_blk)
    try:
        vmem_cap = pltpu.get_tpu_info().vmem_capacity_bytes
    except Exception:
        vmem_cap = 64 * 1024 * 1024              # v7x per-TC floor as a safe fallback
    vmem_limit = min(int(0.8 * vmem_cap), max(32 * 1024 * 1024, need + (8 << 20)))
    vmem_limit = max(vmem_limit, need + (4 << 20))

    # f32 needs HIGHEST so the 0/1 selection matmul is exact; bf16 inputs are exact at
    # default precision (and keeping them bf16 halves HBM traffic).
    precision = lax.Precision.HIGHEST if dtype == jnp.float32 else None

    kernel = functools.partial(_pool_drop_kernel, grp=G, wt=Wt, precision=precision)

    out_rows = pl.pallas_call(
        kernel,
        out_shape=jax.ShapeDtypeStruct((Mp, lanes_out), dtype),
        grid_spec=pltpu.PrefetchScalarGridSpec(
            num_scalar_prefetch=0,
            grid=(pl.cdiv(Mp, tr),),
            in_specs=[
                pl.BlockSpec((tr, lanes_in), lambda i: (i, 0)),
                pl.BlockSpec((K, lanes_out), lambda i: (0, 0)),   # constant block: fetched once
                pl.BlockSpec((tr, 1), lambda i: (i, 0)),
            ],
            out_specs=pl.BlockSpec((tr, lanes_out), lambda i: (i, 0)),
        ),
        compiler_params=pltpu.CompilerParams(
            dimension_semantics=("parallel",),    # shards row tiles across both TCs on v7x
            vmem_limit_bytes=vmem_limit,
        ),
    )(xv, dec, scale_rows)

    # Free contiguous reshape back to the pooled NCHW layout.
    return out_rows.reshape(N, C, Ho, Wo)


if __name__ == "__main__":
    key = jax.random.PRNGKey(0)
    k_x, k_drop = jax.random.split(key)

    N, C, H, W = 2, 4, 16, 16
    dropout_ratio = 0.5

    x = jax.random.normal(k_x, (N, C, H, W), dtype=jnp.float32)
    # TODO(synk): channel keep-mask uses jax.random (deterministic), not PyTorch's RNG stream.
    channel_scale = make_dropout2d_scale(k_drop, N, C, dropout_ratio, training=True)

    out = pool_drop_forward(x, channel_scale)
    out = jax.block_until_ready(out)

    # Reference: MaxPool2d(2) + Dropout2d with the same channel mask.
    ref_pool = x.reshape(N, C, H // 2, 2, W // 2, 2).max(axis=(3, 5))
    ref = ref_pool * channel_scale[:, :, None, None]

    assert out.shape == (N, C, H // 2, W // 2)
    assert jnp.allclose(out, ref, atol=1e-5, rtol=1e-5)

    print("KERNEL_OK")
</pallas_src>

<mosaic_0001>
module attributes {stable_mosaic.version = 11 : i64} {
  func.func @_pool_drop_kernel(%arg0: i32, %arg1: memref<8x256xf32, #tpu.memory_space<vmem>>, %arg2: memref<256x64xf32, #tpu.memory_space<vmem>>, %arg3: memref<8x1xf32, #tpu.memory_space<vmem>>, %arg4: memref<8x64xf32, #tpu.memory_space<vmem>>) attributes {dimension_semantics = [#tpu.dimension_semantics<parallel>], iteration_bounds = array<i64: 1>, scalar_prefetch = 0 : i64, scratch_operands = 0 : i64, tpu.core_type = #tpu.core_type<tc>, window_params = [{transform_indices = @transform_0, window_bounds = array<i64: 8, 256>}, {pipeline_mode = #tpu.pipeline_mode<synchronous>, transform_indices = @transform_1, window_bounds = array<i64: 256, 64>}, {transform_indices = @transform_2, window_bounds = array<i64: 8, 1>}, {transform_indices = @transform_3, window_bounds = array<i64: 8, 64>}]} {
    %c0 = arith.constant 0 : index
    %c0_0 = arith.constant 0 : index
    %0 = vector.load %arg1[%c0, %c0_0] : memref<8x256xf32, #tpu.memory_space<vmem>>, vector<8x256xf32>
    %c240_i32 = arith.constant 240 : i32
    %1 = tpu.dynamic_rotate %0 by %c240_i32 dim 1 : vector<8x256xf32>, i32 -> vector<8x256xf32>
    %2 = arith.maximumf %0, %1 : vector<8x256xf32>
    %c255_i32 = arith.constant 255 : i32
    %3 = tpu.dynamic_rotate %2 by %c255_i32 dim 1 : vector<8x256xf32>, i32 -> vector<8x256xf32>
    %4 = arith.maximumf %2, %3 : vector<8x256xf32>
    %c0_1 = arith.constant 0 : index
    %c0_2 = arith.constant 0 : index
    %5 = vector.load %arg2[%c0_1, %c0_2] : memref<256x64xf32, #tpu.memory_space<vmem>>, vector<256x64xf32>
    %cst = arith.constant dense<0.000000e+00> : vector<8x64xf32>
    %6 = tpu.matmul %4, %5, %cst {dimension_numbers = #tpu.dot_dimension_numbers<[1], [0], [0], [1], [0, 0, 1, 1], [], []>, precision = #tpu.contract_precision<fp32>} : vector<8x256xf32>, vector<256x64xf32>, vector<8x64xf32> -> vector<8x64xf32>
    %c0_3 = arith.constant 0 : index
    %c0_4 = arith.constant 0 : index
    %7 = vector.load %arg3[%c0_3, %c0_4] : memref<8x1xf32, #tpu.memory_space<vmem>>, vector<8x1xf32>
    %8 = vector.broadcast %7 : vector<8x1xf32> to vector<8x64xf32>
    %9 = arith.mulf %6, %8 : vector<8x64xf32>
    %c0_5 = arith.constant 0 : index
    %c0_6 = arith.constant 0 : index
    %10 = vector.load %arg4[%c0_5, %c0_6] : memref<8x64xf32, #tpu.memory_space<vmem>>, vector<8x64xf32>
    tpu.vector_store %arg4[%c0_5, %c0_6], %9 {strides = array<i32>} : memref<8x64xf32, #tpu.memory_space<vmem>>, vector<8x64xf32>,
    return
  }
  func.func @transform_0(%arg0: i32) -> (i32, i32) {
    %c0_i32 = arith.constant 0 : i32
    %c0_i32_0 = arith.constant 0 : i32
    return %arg0, %c0_i32 : i32, i32
  }
  func.func @transform_1(%arg0: i32) -> (i32, i32) {
    %c0_i32 = arith.constant 0 : i32
    %c0_i32_0 = arith.constant 0 : i32
    %c0_i32_1 = arith.constant 0 : i32
    return %c0_i32, %c0_i32_0 : i32, i32
  }
  func.func @transform_2(%arg0: i32) -> (i32, i32) {
    %c0_i32 = arith.constant 0 : i32
    %c0_i32_0 = arith.constant 0 : i32
    return %arg0, %c0_i32 : i32, i32
  }
  func.func @transform_3(%arg0: i32) -> (i32, i32) {
    %c0_i32 = arith.constant 0 : i32
    %c0_i32_0 = arith.constant 0 : i32
    return %arg0, %c0_i32 : i32, i32
  }
}

</mosaic_0001>

<bundles_post_ra>
// kernel: tpu_custom_call.1
= control target key start
LH: loop header
LB: loop body
LE: loop exit
PB: predicated region body
PF: predicated region fallthrough
CT: control target
= control target key end

     0   :  { %s1465_s0 = inlined_call_operand.vmem [shape: f32[8,256], index: 0, kind: input, shape index: {}]   ;;  %s1466_s1 = inlined_call_operand.vmem [shape: f32[256,64], index: 1, kind: input, shape index: {}]   ;;  %s1467_s2 = inlined_call_operand.vmem [shape: f32[8,1], index: 2, kind: input, shape index: {}]   ;;  %s1468_s3 = inlined_call_operand.hbm [shape: f32[8,64], index: 3, kind: output, shape index: {}]  }
   0x1   :  { %v835_v0 = vld [vmem:[%s1465_s0] sm:$0xff] }
   0x2   :  { %8 = vsyncpa [#allocation3], 0  ;;  %s808_s14 = smov 112   ;;  %v841_v1 = vld [vmem:[%s1465_s0 + $0x8] sm:$0xff]  ;;  %v52_v2 = vld [vmem:[%s1466_s1 + $0x78] sm:$0xff]  ;;  %v21_v42 = vlaneseq  ;;  %s809_s30 = smov 127  }
   0x3   :  { %17 = vrot.lane.b32.xlu0 %v835_v0, %s808_s14  ;;  %v51_v3 = vld [vmem:[%s1466_s1 + $0x70] sm:$0xff]  ;;  %v50_v4 = vld [vmem:[%s1466_s1 + $0x68] sm:$0xff]  ;;  %v853_v5 = vand.u32 4294901760, %v52_v2  ;;  %v49_v8 = vld [vmem:[%s1466_s1 + $0x60] sm:$0xff]  ;;  %s767_s29 = sshll.u32 %s1468_s3, 4  ;;  %vm758_vm2 = vcmask 523264   ;;  %s768_s29 = int_to_ptr.hbm [resolvable:$true] %s767_s29 }
   0x4   :  { %v855_v6 = vand.u32 4294901760, %v51_v3  ;;  %v857_v7 = vand.u32 4294901760, %v50_v4  ;;  %v48_v9 = vld [vmem:[%s1466_s1 + $0x58] sm:$0xff]  ;;  %v47_v10 = vld [vmem:[%s1466_s1 + $0x50] sm:$0xff]  ;;  %v868_v11 = vand.u32 4294901760, %v49_v8  ;;  %v46_v14 = vld [vmem:[%s1466_s1 + $0x48] sm:$0xff] }
   0x5   :  { %v870_v12 = vand.u32 4294901760, %v48_v9  ;;  %v872_v13 = vand.u32 4294901760, %v47_v10  ;;  %v45_v15 = vld [vmem:[%s1466_s1 + $0x40] sm:$0xff]  ;;  %v881_v16 = vsub.f32 %v52_v2, %v853_v5  ;;  %266 = vmatpush.msra.mxu3 %v853_v5  ;;  %70 = vmatpush.msra.mxu0 %v853_v5  ;;  %v891_v19 = vand.u32 4294901760, %v46_v14  ;;  %v44_v34 = vld [vmem:[%s1466_s1 + $0x38] sm:$0xff]  ;;  %v43_v35 = vld [vmem:[%s1466_s1 + $0x30] sm:$0xff] }
   0x6   :  { %v884_v17 = vsub.f32 %v51_v3, %v855_v6  ;;  %v887_v18 = vsub.f32 %v50_v4, %v857_v7  ;;  %v894_v20 = vsub.f32 %v49_v8, %v868_v11  ;;  %v899_v22 = vand.u32 4294901760, %v45_v15  ;;  %v42_v36 = vld [vmem:[%s1466_s1 + $0x28] sm:$0xff]  ;;  %v41_v41 = vld [vmem:[%s1466_s1 + $0x20] sm:$0xff]  ;;  %v40_v49 = vld [vmem:[%s1466_s1 + $0x18] sm:$0xff] }
   0x7   :  { %v897_v21 = vsub.f32 %v48_v9, %v870_v12  ;;  %v1481_v23 = vand.u32 4294901760, %v881_v16  ;;  %213 = vmatpush.msra.mxu2 %v881_v16  ;;  %268 = vmatpush.msra.mxu3 %v855_v6  ;;  %v907_v26 = vsub.f32 %v47_v10, %v872_v13  ;;  %v913_v29 = vsub.f32 %v46_v14, %v891_v19  ;;  %v39_v57 = vld [vmem:[%s1466_s1 + $0x10] sm:$0xff]  ;;  %v38_v61 = vld [vmem:[%s1466_s1 + $0x8] sm:$0xff] }
   0x8   :  { %v1480_v24 = vand.u32 4294901760, %v884_v17  ;;  %v1479_v25 = vand.u32 4294901760, %v887_v18  ;;  %v1477_v27 = vand.u32 4294901760, %v894_v20  ;;  %72 = vmatpush.msra.mxu0 %v855_v6  ;;  %v928_v33 = vsub.f32 %v45_v15, %v899_v22  ;;  %v37_v15 = vld [vmem:[%s1466_s1] sm:$0xff] }
   0x9   :  { %v1476_v28 = vand.u32 4294901760, %v897_v21  ;;  %v113_v30 = vsub.f32 %v881_v16, %v1481_v23  ;;  %216 = vmatpush.msra.mxu2 %v884_v17  ;;  %270 = vmatpush.msra.mxu3 %v857_v7  ;;  %v1475_v40 = vand.u32 4294901760, %v907_v26  ;;  %v1473_v44 = vand.u32 4294901760, %v913_v29 }
   0xa   :  { %v119_v31 = vsub.f32 %v884_v17, %v1480_v24  ;;  %v125_v32 = vsub.f32 %v887_v18, %v1479_v25  ;;  %74 = vmatpush.msra.mxu0 %v857_v7  ;;  %v131_v39 = vsub.f32 %v894_v20, %v1477_v27  ;;  %v954_v46 = vand.u32 4294901760, %v44_v34 }
   0xb   :  { %19 = vrot.lane.b32.xlu0 %v841_v1, %s808_s14  ;;  %v114_v37 = vand.u32 4294901760, %v113_v30  ;;  %219 = vmatpush.msra.mxu2 %v887_v18  ;;  %v137_v43 = vsub.f32 %v897_v21, %v1476_v28  ;;  %v956_v47 = vand.u32 4294901760, %v43_v35  ;;  %v958_v48 = vand.u32 4294901760, %v42_v36 }
   0xc   :  { %v120_v38 = vand.u32 4294901760, %v119_v31  ;;  %272 = vmatpush.msra.mxu3 %v868_v11  ;;  %76 = vmatpush.msra.mxu0 %v868_v11  ;;  %v126_v45 = vand.u32 4294901760, %v125_v32  ;;  %v1472_v51 = vand.u32 4294901760, %v928_v33  ;;  %v968_v52 = vand.u32 4294901760, %v41_v41  ;;  %v68_v32 = vld [vmem:[%s1466_s1 + $0xf8] sm:$0xff] }
   0xd   :  { %115 = vmatpush.msra.mxu1 %v114_v37  ;;  %222 = vmatpush.msra.mxu2 %v894_v20  ;;  %v132_v53 = vand.u32 4294901760, %v131_v39  ;;  %v143_v54 = vsub.f32 %v907_v26, %v1475_v40  ;;  %v975_v55 = vsub.f32 %v44_v34, %v954_v46  ;;  %v978_v56 = vsub.f32 %v43_v35, %v956_v47 }
   0xe   :  { %274 = vmatpush.msra.mxu3 %v870_v12  ;;  %78 = vmatpush.msra.mxu0 %v870_v12  ;;  %v983_v58 = vand.u32 127, %v21_v42  ;;  %v988_v59 = vsub.f32 %v42_v36, %v958_v48  ;;  %v990_v60 = vand.u32 4294901760, %v40_v49  ;;  %v138_v62 = vand.u32 4294901760, %v137_v43  ;;  %v67_v36 = vld [vmem:[%s1466_s1 + $0xf0] sm:$0xff]  ;;  %v66_v43 = vld [vmem:[%s1466_s1 + $0xe8] sm:$0xff] }
   0xf   :  { %121 = vmatpush.msra.mxu1 %v120_v38  ;;  %225 = vmatpush.msra.mxu2 %v897_v21  ;;  %v149_v63 = vsub.f32 %v913_v29, %v1473_v44  ;;  %v1471_v2 = vand.u32 4294901760, %v975_v55  ;;  %v155_v3 = vsub.f32 %v928_v33, %v1472_v51  ;;  %v1006_v4 = vsub.f32 %v41_v41, %v968_v52  ;;  %v63_v51 = vld [vmem:[%s1466_s1 + $0xd0] sm:$0xff] }
  0x10   :  { %276 = vmatpush.msra.mxu3 %v872_v13  ;;  %80 = vmatpush.msra.mxu0 %v872_v13  ;;  %v1008_v8 = vand.u32 4294901760, %v39_v57  ;;  %v144_v9 = vand.u32 4294901760, %v143_v54  ;;  %v1469_v10 = vand.u32 4294901760, %v978_v56  ;;  %v1012_v14 = vand.u32 4294901760, %v38_v61 }
  0x11   :  { %127 = vmatpush.msra.mxu1 %v126_v45  ;;  %228 = vmatpush.msra.mxu2 %v907_v26  ;;  %vm23_vm0 = vcmp.lt.s32.totalorder %v983_v58, 112  ;;  %v1470_v30 = vand.u32 4294901760, %v988_v59  ;;  %v1022_v31 = vsub.f32 %v40_v49, %v990_v60  ;;  %v150_v34 = vand.u32 4294901760, %v149_v63  ;;  %v65_v45 = vld [vmem:[%s1466_s1 + $0xe0] sm:$0xff] }
  0x12   :  { %278 = vmatpush.msra.mxu3 %v891_v19  ;;  %82 = vmatpush.msra.mxu0 %v891_v19  ;;  %v161_v35 = vsub.f32 %v975_v55, %v1471_v2  ;;  %v156_v38 = vand.u32 4294901760, %v155_v3  ;;  %v1474_v39 = vand.u32 4294901760, %v1006_v4  ;;  %v1038_v41 = vsub.f32 %v39_v57, %v1008_v8 }
  0x13   :  { %133 = vmatpush.msra.mxu1 %v132_v53  ;;  %231 = vmatpush.msra.mxu2 %v913_v29  ;;  %v1040_v42 = vand.u32 4294901760, %v37_v15  ;;  %v167_v53 = vsub.f32 %v978_v56, %v1469_v10  ;;  %v1056_v54 = vsub.f32 %v38_v61, %v1012_v14  ;;  %v1058_v57 = vand.u32 4294901760, %v68_v32  ;;  %v64_v61 = vld [vmem:[%s1466_s1 + $0xd8] sm:$0xff] }
  0x14   :  { %280 = vmatpush.msra.mxu3 %v899_v22  ;;  %84 = vmatpush.msra.mxu0 %v899_v22  ;;  %v173_v63 = vsub.f32 %v988_v59, %v1470_v30  ;;  %v1478_v3 = vand.u32 4294901760, %v1022_v31  ;;  %v162_v10 = vand.u32 4294901760, %v161_v35  ;;  %v1080_v30 = vand.u32 4294901760, %v65_v45 }
  0x15   :  { %139 = vmatpush.msra.mxu1 %v138_v62  ;;  %234 = vmatpush.msra.mxu2 %v928_v33  ;;  %v179_v2 = vsub.f32 %v1006_v4, %v1474_v39  ;;  %v1090_v35 = vsub.f32 %v37_v15, %v1040_v42  ;;  %v168_v44 = vand.u32 4294901760, %v167_v53  ;;  %v1103_v28 = vand.u32 4294901760, %v64_v61  ;;  %v62_v53 = vld [vmem:[%s1466_s1 + $0xc8] sm:$0xff] }
  0x16   :  { %282 = vmatpush.msra.mxu3 %v954_v46  ;;  %86 = vmatpush.msra.mxu0 %v954_v46  ;;  %v185_v15 = vsub.f32 %v1022_v31, %v1478_v3  ;;  %v174_v27 = vand.u32 4294901760, %v173_v63  ;;  %v1120_v3 = vsub.f32 %v65_v45, %v1080_v30  ;;  %v1122_v25 = vand.u32 4294901760, %v63_v51 }
  0x17   :  { %145 = vmatpush.msra.mxu1 %v144_v9  ;;  %237 = vmatpush.msra.mxu2 %v975_v55  ;;  %v1069_v9 = vand.u32 4294901760, %v67_v36  ;;  %v1487_v23 = vand.u32 4294901760, %v1090_v35  ;;  %v1136_v45 = vsub.f32 %v64_v61, %v1103_v28  ;;  %v1138_v63 = vand.u32 4294901760, %v62_v53 }
  0x18   :  { %284 = vmatpush.msra.mxu3 %v956_v47  ;;  %88 = vmatpush.msra.mxu0 %v956_v47  ;;  %vm32_vm1 = vcmp.lt.s32.totalorder %v983_v58, 127 }
  0x19   :  { %151 = vmatpush.msra.mxu1 %v150_v34  ;;  %240 = vmatpush.msra.mxu2 %v978_v56  ;;  %v1482_v34 = vand.u32 4294901760, %v1038_v41 }
  0x1a   :  { %286 = vmatpush.msra.mxu3 %v958_v48  ;;  %90 = vmatpush.msra.mxu0 %v958_v48 }
  0x1b   :  { %157 = vmatpush.msra.mxu1 %v156_v38  ;;  %243 = vmatpush.msra.mxu2 %v988_v59  ;;  %v191_v24 = vsub.f32 %v1038_v41, %v1482_v34 }
  0x1c   :  { %288 = vmatpush.msra.mxu3 %v968_v52  ;;  %92 = vmatpush.msra.mxu0 %v968_v52 }
  0x1d   :  { %163 = vmatpush.msra.mxu1 %v162_v10  ;;  %246 = vmatpush.msra.mxu2 %v1006_v4  ;;  %v180_v10 = vand.u32 4294901760, %v179_v2  ;;  %v186_v2 = vand.u32 4294901760, %v185_v15 }
  0x1e   :  { %290 = vmatpush.msra.mxu3 %v990_v60  ;;  %94 = vmatpush.msra.mxu0 %v990_v60 }
  0x1f   :  { %169 = vmatpush.msra.mxu1 %v168_v44  ;;  %249 = vmatpush.msra.mxu2 %v1022_v31 }
  0x20   :  { %292 = vmatpush.msra.mxu3 %v1008_v8  ;;  %96 = vmatpush.msra.mxu0 %v1008_v8 }
  0x21   :  { %175 = vmatpush.msra.mxu1 %v174_v27  ;;  %252 = vmatpush.msra.mxu2 %v1038_v41  ;;  %v203_v27 = vsub.f32 %v1090_v35, %v1487_v23 }
  0x22   :  { %294 = vmatpush.msra.mxu3 %v1012_v14  ;;  %98 = vmatpush.msra.mxu0 %v1012_v14 }
  0x23   :  { %181 = vmatpush.msra.mxu1 %v180_v10  ;;  %255 = vmatpush.msra.mxu2 %v1056_v54 }
  0x24   :  { %296 = vmatpush.msra.mxu3 %v1040_v42  ;;  %100 = vmatpush.msra.mxu0 %v1040_v42 }
  0x25   :  { %187 = vmatpush.msra.mxu1 %v186_v2  ;;  %258 = vmatpush.msra.mxu2 %v1090_v35 }
  0x27   :  { %411 = vmatpush.msrb.mxu2 %v1058_v57 }
  0x29   :  { %413 = vmatpush.msrb.mxu2 %v1069_v9 }
  0x75   :  { %v963_v50 = vpop.permute.xlu0 %17 }
  0x7d   :  { %v20_v37 = vpop.permute.xlu0 %19 }
  0x7e   :  { %v24_v49 = vsel %vm23_vm0, %v963_v50, %v20_v37 }
  0x7f   :  { %v1061_v62 = vmax.f32 %v835_v0, %v24_v49  ;;  %v1076_v0 = vsub.f32 %v68_v32, %v1058_v57  ;;  %v1078_v49 = vand.u32 4294901760, %v66_v43  ;;  %v1093_v32 = vsub.f32 %v67_v36, %v1069_v9 }
  0x80   :  { %v1485_v36 = vand.u32 4294901760, %v1056_v54 }
  0x81   :  { %28 = vrot.lane.b32.xlu1 %v1061_v62, %s809_s30  ;;  %v1483_v39 = vand.u32 4294901760, %v1076_v0  ;;  %v1101_v40 = vsub.f32 %v66_v43, %v1078_v49  ;;  %v1484_v38 = vand.u32 4294901760, %v1093_v32  ;;  %v25_v43 = vsel %vm23_vm0, %v20_v37, %v963_v50  ;;  %415 = vmatpush.msrb.mxu2 %v1078_v49 }
  0x82   :  { %v1141_v34 = vmax.f32 %v841_v1, %v25_v43  ;;  %v197_v61 = vsub.f32 %v1056_v54, %v1485_v36  ;;  %v1154_v1 = vsub.f32 %v63_v51, %v1122_v25  ;;  %v192_v43 = vand.u32 4294901760, %v191_v24 }
  0x83   :  { %v454_v50 = vsub.f32 %v1076_v0, %v1483_v39  ;;  %v1486_v37 = vand.u32 4294901760, %v1101_v40  ;;  %v460_v44 = vsub.f32 %v1093_v32, %v1484_v38  ;;  %v471_v39 = vand.u32 4294901760, %v1120_v3  ;;  %417 = vmatpush.msrb.mxu2 %v1080_v30 }
  0x84   :  { %v477_v51 = vand.u32 4294901760, %v1136_v45  ;;  %v1168_v36 = vsub.f32 %v62_v53, %v1138_v63  ;;  %193 = vmatpush.msra.mxu1 %v192_v43  ;;  %v204_v53 = vand.u32 4294901760, %v203_v27  ;;  %v1488_v43 = vand.u32 4294901760, %v881_v16 }
  0x85   :  { %v455_v38 = vand.u32 4294901760, %v454_v50  ;;  %v466_v15 = vsub.f32 %v1101_v40, %v1486_v37  ;;  %v461_v24 = vand.u32 4294901760, %v460_v44  ;;  %v198_v50 = vand.u32 4294901760, %v197_v61  ;;  %419 = vmatpush.msrb.mxu2 %v1103_v28 }
  0x86   :  { %v472_v10 = vsub.f32 %v1120_v3, %v471_v39  ;;  %v483_v37 = vand.u32 4294901760, %v1154_v1  ;;  %v478_v44 = vsub.f32 %v1136_v45, %v477_v51  ;;  %v489_v2 = vand.u32 4294901760, %v1168_v36  ;;  %307 = vmatpush.msrb.mxu0 %v1488_v43 }
  0x87   :  { %456 = vmatpush.msrb.mxu3 %v455_v38  ;;  %v467_v23 = vand.u32 4294901760, %v466_v15  ;;  %199 = vmatpush.msra.mxu1 %v198_v50  ;;  %v1490_v16 = vand.u32 4294901760, %v887_v18  ;;  %v1492_v18 = vand.u32 4294901760, %v897_v21  ;;  %v1496_v21 = vand.u32 4294901760, %v975_v55 }
  0x88   :  { %v473_v61 = vand.u32 4294901760, %v472_v10  ;;  %v484_v38 = vsub.f32 %v1154_v1, %v483_v37  ;;  %v479_v27 = vand.u32 4294901760, %v478_v44  ;;  %v490_v15 = vsub.f32 %v1168_v36, %v489_v2  ;;  %421 = vmatpush.msrb.mxu2 %v1122_v25  ;;  %v56_v44 = vld [vmem:[%s1466_s1 + $0x98] sm:$0xff] }
  0x89   :  { %30 = vrot.lane.b32.xlu1 %v1141_v34, %s809_s30  ;;  %462 = vmatpush.msrb.mxu3 %v461_v24  ;;  %v1489_v24 = vand.u32 4294901760, %v884_v17  ;;  %v1491_v17 = vand.u32 4294901760, %v894_v20  ;;  %v1494_v20 = vand.u32 4294901760, %v913_v29  ;;  %v1502_v29 = vand.u32 4294901760, %v1056_v54 }
  0x8a   :  { %205 = vmatpush.msra.mxu1 %v204_v53  ;;  %v485_v50 = vand.u32 4294901760, %v484_v38  ;;  %423 = vmatpush.msrb.mxu2 %v1138_v63  ;;  %v1301_v43 = vand.u32 4294901760, %v56_v44 }
  0x8b   :  { %468 = vmatpush.msrb.mxu3 %v467_v23  ;;  %311 = vmatpush.msrb.mxu0 %v1489_v24  ;;  %v61_v23 = vld [vmem:[%s1466_s1 + $0xc0] sm:$0xff]  ;;  %v55_v24 = vld [vmem:[%s1466_s1 + $0x90] sm:$0xff] }
  0x8c   :  { %374 = vmatpush.msrb.mxu1 %v853_v5  ;;  %v491_v5 = vand.u32 4294901760, %v490_v15 }
  0x8d   :  { %474 = vmatpush.msrb.mxu3 %v473_v61  ;;  %315 = vmatpush.msrb.mxu0 %v1490_v16 }
  0x8e   :  { %376 = vmatpush.msrb.mxu1 %v855_v6  ;;  %v1211_v6 = vand.u32 4294901760, %v61_v23 }
  0x8f   :  { %480 = vmatpush.msrb.mxu3 %v479_v27  ;;  %319 = vmatpush.msrb.mxu0 %v1491_v17 }
  0x90   :  { %378 = vmatpush.msrb.mxu1 %v857_v7  ;;  %425 = vmatpush.msrb.mxu2 %v1211_v6  ;;  %v1493_v7 = vand.u32 4294901760, %v907_v26  ;;  %v1501_v26 = vand.u32 4294901760, %v1038_v41  ;;  %v57_v41 = vld [vmem:[%s1466_s1 + $0xa0] sm:$0xff] }
  0x91   :  { %486 = vmatpush.msrb.mxu3 %v485_v50  ;;  %323 = vmatpush.msrb.mxu0 %v1492_v18  ;;  %v1289_v10 = vand.u32 4294901760, %v57_v41  ;;  %v54_v18 = vld [vmem:[%s1466_s1 + $0x88] sm:$0xff] }
  0x92   :  { %380 = vmatpush.msrb.mxu1 %v868_v11  ;;  %v1495_v11 = vand.u32 4294901760, %v928_v33  ;;  %v1503_v33 = vand.u32 4294901760, %v1090_v35 }
  0x93   :  { %492 = vmatpush.msrb.mxu3 %v491_v5  ;;  %327 = vmatpush.msrb.mxu0 %v1493_v7  ;;  %v1304_v27 = vsub.f32 %v57_v41, %v1289_v10  ;;  %v1315_v5 = vsub.f32 %v56_v44, %v1301_v43 }
  0x94   :  { %382 = vmatpush.msrb.mxu1 %v870_v12  ;;  %v1497_v12 = vand.u32 4294901760, %v978_v56 }
  0x95   :  { %331 = vmatpush.msrb.mxu0 %v1494_v20  ;;  %v519_v16 = vand.u32 4294901760, %v1304_v27  ;;  %v525_v20 = vand.u32 4294901760, %v1315_v5 }
  0x96   :  { %384 = vmatpush.msrb.mxu1 %v872_v13  ;;  %v1498_v13 = vand.u32 4294901760, %v988_v59 }
  0x97   :  { %335 = vmatpush.msrb.mxu0 %v1495_v11  ;;  %v520_v7 = vsub.f32 %v1304_v27, %v519_v16  ;;  %v1328_v11 = vand.u32 4294901760, %v54_v18 }
  0x98   :  { %386 = vmatpush.msrb.mxu1 %v891_v19  ;;  %v1499_v19 = vand.u32 4294901760, %v1006_v4 }
  0x99   :  { %339 = vmatpush.msrb.mxu0 %v1496_v21 }
  0x9a   :  { %388 = vmatpush.msrb.mxu1 %v899_v22  ;;  %v1500_v22 = vand.u32 4294901760, %v1022_v31 }
  0x9b   :  { %343 = vmatpush.msrb.mxu0 %v1497_v12 }
  0x9c   :  { %390 = vmatpush.msrb.mxu1 %v954_v46  ;;  %v60_v46 = vld [vmem:[%s1466_s1 + $0xb8] sm:$0xff] }
  0x9d   :  { %347 = vmatpush.msrb.mxu0 %v1498_v13  ;;  %v521_v13 = vand.u32 4294901760, %v520_v7 }
  0x9e   :  { %392 = vmatpush.msrb.mxu1 %v956_v47  ;;  %v1253_v47 = vand.u32 4294901760, %v60_v46 }
  0x9f   :  { %351 = vmatpush.msrb.mxu0 %v1499_v19  ;;  %v526_v19 = vsub.f32 %v1315_v5, %v525_v20 }
  0xa0   :  { %394 = vmatpush.msrb.mxu1 %v958_v48  ;;  %v1256_v48 = vsub.f32 %v61_v23, %v1211_v6  ;;  %427 = vmatpush.msrb.mxu2 %v1253_v47  ;;  %v1266_v59 = vsub.f32 %v60_v46, %v1253_v47  ;;  %v1312_v23 = vand.u32 4294901760, %v55_v24 }
  0xa1   :  { %355 = vmatpush.msrb.mxu0 %v1500_v22  ;;  %v527_v46 = vand.u32 4294901760, %v526_v19 }
  0xa2   :  { %396 = vmatpush.msrb.mxu1 %v968_v52  ;;  %v59_v52 = vld [vmem:[%s1466_s1 + $0xb0] sm:$0xff]  ;;  %v495_v55 = vand.u32 4294901760, %v1256_v48  ;;  %v1331_v21 = vsub.f32 %v55_v24, %v1312_v23 }
  0xa3   :  { %359 = vmatpush.msrb.mxu0 %v1501_v26  ;;  %v1263_v56 = vand.u32 4294901760, %v59_v52  ;;  %v53_v26 = vld [vmem:[%s1466_s1 + $0x80] sm:$0xff] }
  0xa4   :  { %398 = vmatpush.msrb.mxu1 %v990_v60  ;;  %v58_v60 = vld [vmem:[%s1466_s1 + $0xa8] sm:$0xff]  ;;  %v496_v4 = vsub.f32 %v1256_v48, %v495_v55  ;;  %v531_v22 = vand.u32 4294901760, %v1331_v21 }
  0xa5   :  { %363 = vmatpush.msrb.mxu0 %v1502_v29  ;;  %429 = vmatpush.msrb.mxu2 %v1263_v56  ;;  %v1279_v31 = vsub.f32 %v59_v52, %v1263_v56  ;;  %v1341_v29 = vand.u32 4294901760, %v53_v26 }
  0xa6   :  { %400 = vmatpush.msrb.mxu1 %v1008_v8  ;;  %v501_v8 = vand.u32 4294901760, %v1266_v59  ;;  %v532_v52 = vsub.f32 %v1331_v21, %v531_v22 }
  0xa7   :  { %367 = vmatpush.msrb.mxu0 %v1503_v33  ;;  %v507_v35 = vand.u32 4294901760, %v1279_v31  ;;  %v1344_v33 = vsub.f32 %v54_v18, %v1328_v11 }
  0xa8   :  { %402 = vmatpush.msrb.mxu1 %v1012_v14  ;;  %v1276_v14 = vand.u32 4294901760, %v58_v60  ;;  %v502_v54 = vsub.f32 %v1266_v59, %v501_v8  ;;  %v533_v41 = vand.u32 4294901760, %v532_v52 }
  0xa9   :  { %v508_v38 = vsub.f32 %v1279_v31, %v507_v35 }
  0xaa   :  { %404 = vmatpush.msrb.mxu1 %v1040_v42  ;;  %v497_v42 = vand.u32 4294901760, %v496_v4  ;;  %431 = vmatpush.msrb.mxu2 %v1276_v14  ;;  %v1292_v53 = vsub.f32 %v58_v60, %v1276_v14  ;;  %v503_v61 = vand.u32 4294901760, %v502_v54  ;;  %v537_v60 = vand.u32 4294901760, %v1344_v33 }
  0xab   :  { %v509_v50 = vand.u32 4294901760, %v508_v38  ;;  %v1352_v4 = vsub.f32 %v53_v26, %v1341_v29 }
  0xac   :  { %498 = vmatpush.msrb.mxu3 %v497_v42  ;;  %433 = vmatpush.msrb.mxu2 %v1289_v10  ;;  %v513_v15 = vand.u32 4294901760, %v1292_v53  ;;  %v538_v42 = vsub.f32 %v1344_v33, %v537_v60 }
  0xad   :  { %v543_v54 = vand.u32 4294901760, %v1352_v4 }
  0xae   :  { %504 = vmatpush.msrb.mxu3 %v503_v61  ;;  %435 = vmatpush.msrb.mxu2 %v1301_v43  ;;  %v514_v17 = vsub.f32 %v1292_v53, %v513_v15  ;;  %v539_v44 = vand.u32 4294901760, %v538_v42 }
  0xaf   :  { %v544_v61 = vsub.f32 %v1352_v4, %v543_v54 }
  0xb0   :  { %510 = vmatpush.msrb.mxu3 %v509_v50  ;;  %437 = vmatpush.msrb.mxu2 %v1312_v23  ;;  %v515_v12 = vand.u32 4294901760, %v514_v17 }
  0xb1   :  { %v545_v38 = vand.u32 4294901760, %v544_v61  ;;  %v1506_v61 = vand.u32 4294901760, %v1101_v40 }
  0xb2   :  { %439 = vmatpush.msrb.mxu2 %v1328_v11  ;;  %516 = vmatpush.msrb.mxu3 %v515_v12 }
  0xb4   :  { %522 = vmatpush.msrb.mxu3 %v521_v13  ;;  %441 = vmatpush.msrb.mxu2 %v1341_v29 }
  0xb6   :  { %528 = vmatpush.msrb.mxu3 %v527_v46 }
  0xb8   :  { %534 = vmatpush.msrb.mxu3 %v533_v41  ;;  %v1505_v41 = vand.u32 4294901760, %v1093_v32 }
  0xba   :  { %540 = vmatpush.msrb.mxu3 %v539_v44 }
  0xbc   :  { %546 = vmatpush.msrb.mxu3 %v545_v38 }
  0xf3   :  { %v29_v24 = vpop.permute.xlu1 %28 }
  0xfb   :  { %v31_v50 = vpop.permute.xlu1 %30 }
  0xfc   :  { %v33_v17 = vsel %vm32_vm1, %v29_v24, %v31_v50  ;;  %v34_v18 = vsel %vm32_vm1, %v31_v50, %v29_v24 }
  0xfd   :  { %v35_v7 = vmax.f32 %v1061_v62, %v33_v17  ;;  %v36_v12 = vmax.f32 %v1141_v34, %v34_v18  ;;  %v1504_v62 = vand.u32 4294901760, %v1076_v0 }
  0xff   :  { %v101_v13 = vand.u32 4294901760, %v35_v7  ;;  %v1364_v19 = vand.u32 4294901760, %v36_v12 }
 0x101   :  { %v1367_v26 = vsub.f32 %v36_v12, %v1364_v19  ;;  %207 = vmatmul.f32.vlgmr.msra.gmra.mxu1 %v101_v13  ;;  %v102_v46 = vsub.f32 %v35_v7, %v101_v13 }
 0x102   :  { %607 = vmatpush.msra.mxu1 %v1058_v57 }
 0x103   :  { %261 = vmatmul.f32.vlgmr.msra.gmra.mxu2 %v102_v46  ;;  %v103_v52 = vand.u32 4294901760, %v102_v46  ;;  %v444_v58 = vand.u32 4294901760, %v1367_v26 }
 0x104   :  { %609 = vmatpush.msra.mxu1 %v1069_v9  ;;  %648 = vmatpush.msra.mxu2 %v1504_v62 }
 0x105   :  { %300 = vmatmul.f32.vlgmr.msra.gmra.mxu3 %v103_v52  ;;  %v104_v34 = vsub.f32 %v102_v46, %v103_v52  ;;  %v445_v42 = vsub.f32 %v1367_v26, %v444_v58 }
 0x106   :  { %611 = vmatpush.msra.mxu1 %v1078_v49  ;;  %652 = vmatpush.msra.mxu2 %v1505_v41 }
 0x107   :  { %715 = vmatpush.msra.mxu3 %v1058_v57  ;;  %v105_v44 = vand.u32 4294901760, %v104_v34  ;;  %v446_v38 = vand.u32 4294901760, %v445_v42 }
 0x108   :  { %613 = vmatpush.msra.mxu1 %v1080_v30  ;;  %656 = vmatpush.msra.mxu2 %v1506_v61 }
 0x109   :  { %717 = vmatpush.msra.mxu3 %v1069_v9  ;;  %106 = vmatmul.f32.vlgmr.msra.gmra.mxu0 %v105_v44 }
 0x10a   :  { %406 = vmatmul.f32.vlgmr.msrb.gmra.mxu1 %v101_v13  ;;  %554 = vmatpush.msra.mxu0 %v1076_v0 }
 0x10b   :  { %615 = vmatpush.msra.mxu1 %v1103_v28  ;;  %660 = vmatpush.msra.mxu2 %v471_v39 }
 0x10c   :  { %719 = vmatpush.msra.mxu3 %v1078_v49  ;;  %447 = vmatmul.f32.vlgmr.msrb.gmra.mxu2 %v446_v38 }
 0x10d   :  { %557 = vmatpush.msra.mxu0 %v1093_v32  ;;  %617 = vmatpush.msra.mxu1 %v1122_v25 }
 0x10e   :  { %664 = vmatpush.msra.mxu2 %v477_v51  ;;  %721 = vmatpush.msra.mxu3 %v1080_v30 }
 0x10f   :  { %548 = vmatmul.f32.vlgmr.msrb.gmra.mxu3 %v1364_v19  ;;  %560 = vmatpush.msra.mxu0 %v1101_v40 }
 0x110   :  { %619 = vmatpush.msra.mxu1 %v1138_v63  ;;  %668 = vmatpush.msra.mxu2 %v483_v37 }
 0x111   :  { %723 = vmatpush.msra.mxu3 %v1103_v28  ;;  %563 = vmatpush.msra.mxu0 %v1120_v3  ;;  %v810_v28 = vmov 0  }
 0x112   :  { %621 = vmatpush.msra.mxu1 %v1211_v6  ;;  %672 = vmatpush.msra.mxu2 %v489_v2 }
 0x113   :  { %725 = vmatpush.msra.mxu3 %v1122_v25  ;;  %369 = vmatmul.f32.vlgmr.msrb.gmra.mxu0 %v101_v13  ;;  %v751_v25 = vld [vmem:[%s1467_s2] sm:$0xff]  ;;  %s811_s2 = smov [#allocation2]  }
 0x114   :  { %566 = vmatpush.msra.mxu0 %v1136_v45  ;;  %623 = vmatpush.msra.mxu1 %v1253_v47  ;;  %s765_s26 = sshll.u32 %s811_s2, 4  ;;  %s766_s26 = int_to_ptr.vmem [resolvable:$true] %s765_s26 }
 0x115   :  { %676 = vmatpush.msra.mxu2 %v495_v55  ;;  %727 = vmatpush.msra.mxu3 %v1138_v63 }
 0x116   :  { %569 = vmatpush.msra.mxu0 %v1154_v1  ;;  %625 = vmatpush.msra.mxu1 %v1263_v56 }
 0x117   :  { %680 = vmatpush.msra.mxu2 %v501_v8  ;;  %729 = vmatpush.msra.mxu3 %v1211_v6 }
 0x118   :  { %572 = vmatpush.msra.mxu0 %v1168_v36  ;;  %627 = vmatpush.msra.mxu1 %v1276_v14 }
 0x119   :  { %684 = vmatpush.msra.mxu2 %v507_v35  ;;  %731 = vmatpush.msra.mxu3 %v1253_v47 }
 0x11a   :  { %575 = vmatpush.msra.mxu0 %v1256_v48  ;;  %629 = vmatpush.msra.mxu1 %v1289_v10 }
 0x11b   :  { %688 = vmatpush.msra.mxu2 %v513_v15  ;;  %733 = vmatpush.msra.mxu3 %v1263_v56 }
 0x11c   :  { %578 = vmatpush.msra.mxu0 %v1266_v59  ;;  %631 = vmatpush.msra.mxu1 %v1301_v43 }
 0x11d   :  { %692 = vmatpush.msra.mxu2 %v519_v16  ;;  %735 = vmatpush.msra.mxu3 %v1276_v14 }
 0x11e   :  { %581 = vmatpush.msra.mxu0 %v1279_v31  ;;  %633 = vmatpush.msra.mxu1 %v1312_v23 }
 0x11f   :  { %696 = vmatpush.msra.mxu2 %v525_v20  ;;  %737 = vmatpush.msra.mxu3 %v1289_v10 }
 0x120   :  { %584 = vmatpush.msra.mxu0 %v1292_v53  ;;  %635 = vmatpush.msra.mxu1 %v1328_v11 }
 0x121   :  { %700 = vmatpush.msra.mxu2 %v531_v22  ;;  %739 = vmatpush.msra.mxu3 %v1301_v43 }
 0x122   :  { %587 = vmatpush.msra.mxu0 %v1304_v27  ;;  %637 = vmatpush.msra.mxu1 %v1341_v29 }
 0x123   :  { %704 = vmatpush.msra.mxu2 %v537_v60  ;;  %741 = vmatpush.msra.mxu3 %v1312_v23 }
 0x124   :  { %641 = vmatmul.f32.vlgmr.msra.gmra.mxu1 %v444_v58  ;;  %590 = vmatpush.msra.mxu0 %v1315_v5 }
 0x125   :  { %708 = vmatpush.msra.mxu2 %v543_v54  ;;  %743 = vmatpush.msra.mxu3 %v1328_v11 }
 0x126   :  { %710 = vmatmul.f32.vlgmr.msra.gmra.mxu2 %v1364_v19  ;;  %593 = vmatpush.msra.mxu0 %v1331_v21 }
 0x127   :  { %745 = vmatpush.msra.mxu3 %v1341_v29  ;;  %780 = vset.pattern.permute.xlu2 %v810_v28 }
 0x128   :  { %747 = vmatmul.f32.vlgmr.msra.gmra.mxu3 %v1364_v19  ;;  %596 = vmatpush.msra.mxu0 %v1344_v33 }
 0x129   :  { %754 = vperm.xlu2 %780, %v751_v25   ;;  %781 = vset.pattern.permute.xlu0 %v810_v28 }
 0x12a   :  { %599 = vmatpush.msra.mxu0 %v1352_v4 }
 0x12b   :  { %602 = vmatmul.f32.vlgmr.msra.gmra.mxu0 %v1367_v26 }
 0x17e   :  { %v208_v30 = vpop.f32.mrf.mxu1 }
 0x183   :  { %v755_v8 = vpop.permute.xlu2 %754 }
 0x186   :  { %v107_v40 = vpop.f32.mrf.mxu0  ;;  %v262_v57 = vpop.f32.mrf.mxu2 }
 0x187   :  { %v209_v39 = vadd.f32 %v208_v30, %v107_v40  ;;  %v407_v36 = vpop.f32.mrf.mxu1 }
 0x188   :  { %v301_v9 = vpop.f32.mrf.mxu3 }
 0x189   :  { %v263_v3 = vadd.f32 %v262_v57, %v209_v39 }
 0x18b   :  { %v302_v49 = vadd.f32 %v301_v9, %v263_v3 }
 0x18f   :  { %v448_v45 = vpop.f32.mrf.mxu2 }
 0x190   :  { %v370_v0 = vpop.f32.mrf.mxu0 }
 0x191   :  { %v371_v32 = vadd.f32 %v370_v0, %v302_v49 }
 0x192   :  { %v549_v1 = vpop.f32.mrf.mxu3 }
 0x193   :  { %v408_v37 = vadd.f32 %v407_v36, %v371_v32 }
 0x195   :  { %v449_v63 = vadd.f32 %v448_v45, %v408_v37 }
 0x197   :  { %v550_v51 = vadd.f32 %v549_v1, %v449_v63 }
 0x1a1   :  { %v642_v47 = vpop.f32.mrf.mxu1 }
 0x1a8   :  { %v603_v2 = vpop.f32.mrf.mxu0 }
 0x1a9   :  { %v604_v6 = vadd.f32 %v603_v2, %v550_v51  ;;  %v711_v55 = vpop.f32.mrf.mxu2 }
 0x1ab   :  { %v643_v48 = vadd.f32 %v642_v47, %v604_v6  ;;  %v748_v59 = vpop.f32.mrf.mxu3 }
 0x1ad   :  { %v712_v56 = vadd.f32 %v711_v55, %v643_v48 }
 0x1af   :  { %v749_v14 = vadd.f32 %v748_v59, %v712_v56 }
 0x1b1   :  { %v757_v31 = vmul.f32 %v755_v8, %v749_v14 }
 0x1b3   :  { %759 = vst.msk [vmem:[#allocation2] sm:$0xff] %vm758_vm2, %v757_v31 }
 0x1b4   :  { %770 = dma.vmem_to_hbm [thread:$0]  %s766_s26, 128, %s768_s29, [#allocation3]  }
 0x1b5   :  { %806 = dma.done.wait [#allocation3], 128  }
 0x1b6   :  { %807 = vsyncadd [#allocation3], 4294967168 }
 0x1b7   :  { %775 = vsyncpa [#allocation3], 1 }

</bundles_post_ra>
